<compile_context>
chip_gen: v6e
topology: v6e:2x2x1
jax: 0.10.0
libtpu: 0.0.40
codegen_flags: <defaults>
</compile_context>

<pallas_src>
import functools

import jax
import jax.numpy as jnp
from jax import lax
from jax.experimental import pallas as pl
from jax.experimental.pallas import tpu as pltpu


def _dce_tile_kernel(logits_ref, labels_ref, loss_ref, *, tile_rows, total_rows):
    """One row tile: masked soft-label CE partial sum -> (1, 1, 1) output block."""
    i = pl.program_id(0)

    x = logits_ref[...].astype(jnp.float32)   # (TB, C)
    y = labels_ref[...].astype(jnp.float32)   # (TB, C)

    # Stable row-wise log-sum-exp.  Since logprobs = x - m - lse:
    #   -sum_c y * (x - m - lse) = (m + lse) * sum_c y - sum_c y * x
    m = jnp.max(x, axis=-1, keepdims=True)                            # (TB, 1)
    lse = jnp.log(jnp.sum(jnp.exp(x - m), axis=-1, keepdims=True))    # (TB, 1)
    sum_y = jnp.sum(y, axis=-1, keepdims=True)                        # (TB, 1)
    sum_yx = jnp.sum(y * x, axis=-1, keepdims=True)                   # (TB, 1)
    row_loss = (m + lse) * sum_y - sum_yx                             # (TB, 1)

    # Mask rows past the end of the batch (the last tile may be ragged; its
    # padded rows contain undefined data, but the select discards them).
    row = lax.broadcasted_iota(jnp.int32, (tile_rows, 1), 0)
    valid = (i * tile_rows + row) < total_rows
    row_loss = jnp.where(valid, row_loss, 0.0)

    loss_ref[...] = jnp.sum(row_loss) * jnp.ones((1, 1, 1), jnp.float32)


def _pick_tile_rows(n_rows, n_classes, pair_bytes):
    """Auto-pick a row tile.

    Targets ~1-2 MiB per input block (amortizes per-grid-step overhead) while
    keeping 2 inputs x 2 pipeline buffers comfortably inside VMEM on every
    generation (v7x has only 64 MiB per TensorCore).
    """
    vmem_input_budget = 32 * 1024 * 1024
    bytes_per_row = 2 * n_classes * pair_bytes          # both inputs, double-buffered
    rows_vmem_cap = max(1, vmem_input_budget // bytes_per_row)
    rows_target = max(256, (2 * 1024 * 1024) // max(1, n_classes * pair_bytes))
    tile = int(min(rows_vmem_cap, rows_target))
    # Multiple of 32 is a legal sublane tile for f32 (8), bf16 (16) and fp8 (32).
    tile = max(32, (tile // 32) * 32)
    if tile >= n_rows:
        return n_rows                                   # full-extent block is always legal
    return tile


def dense_cross_entropy(logits, labels, *, tile_rows=None):
    """loss = mean over rows of  -sum_c labels * log_softmax(logits)."""
    assert logits.shape == labels.shape, (logits.shape, labels.shape)
    C = logits.shape[-1]
    logits2 = logits.reshape(-1, C)
    labels2 = labels.reshape(-1, C)
    B = logits2.shape[0]

    pair_bytes = jnp.dtype(logits2.dtype).itemsize + jnp.dtype(labels2.dtype).itemsize
    if tile_rows is None:
        tile_rows = _pick_tile_rows(B, C, pair_bytes)
    tile_rows = max(1, min(int(tile_rows), B))

    num_tiles = pl.cdiv(B, tile_rows)

    kernel = functools.partial(_dce_tile_kernel, tile_rows=tile_rows, total_rows=B)

    partials = pl.pallas_call(
        kernel,
        out_shape=jax.ShapeDtypeStruct((num_tiles, 1, 1), jnp.float32),
        grid_spec=pltpu.PrefetchScalarGridSpec(
            num_scalar_prefetch=0,
            grid=(num_tiles,),
            in_specs=[
                pl.BlockSpec((tile_rows, C), lambda i: (i, 0)),
                pl.BlockSpec((tile_rows, C), lambda i: (i, 0)),
            ],
            out_specs=pl.BlockSpec((1, 1, 1), lambda i: (i, 0, 0)),
        ),
        compiler_params=pltpu.CompilerParams(
            # Every tile is independent -> megacore sharding on v7x.
            dimension_semantics=("parallel",),
            # Raise scoped VMEM above v5e's 16 MiB default; stays below v7x's
            # 64 MiB physical per-TC VMEM.
            vmem_limit_bytes=48 * 1024 * 1024,
        ),
    )(logits2, labels2)

    # Tiny cross-tile reduction + mean in plain XLA.
    return jnp.sum(partials) / B


if __name__ == "__main__":
    key = jax.random.PRNGKey(0)
    k1, k2, k3, k4, k5, k6 = jax.random.split(key, 6)

    def ref_loss(lg, lb):
        lg = lg.astype(jnp.float32)
        lb = lb.astype(jnp.float32)
        return jnp.mean(jnp.sum(-lb * jax.nn.log_softmax(lg, axis=-1), axis=-1))

    # 1) Small f32 case (auto tile -> single full-extent block).
    B, C = 16, 128
    logits = jax.random.normal(k1, (B, C), dtype=jnp.float32)
    labels = jax.nn.softmax(jax.random.normal(k2, (B, C), dtype=jnp.float32), axis=-1)
    out = jax.block_until_ready(dense_cross_entropy(logits, labels))
    ref = ref_loss(logits, labels)
    assert jnp.allclose(out, ref, rtol=1e-5, atol=1e-5), (out, ref)

    # 2) Ragged batch with an explicit small tile (exercises the masked tail tile).
    B2, C2 = 40, 128
    lg2 = jax.random.normal(k3, (B2, C2), dtype=jnp.float32)
    lb2 = jax.nn.softmax(jax.random.normal(k4, (B2, C2), dtype=jnp.float32), axis=-1)
    out2 = jax.block_until_ready(dense_cross_entropy(lg2, lb2, tile_rows=16))
    ref2 = ref_loss(lg2, lb2)
    assert jnp.allclose(out2, ref2, rtol=1e-5, atol=1e-5), (out2, ref2)

    # 3) bf16 inputs (halves HBM traffic; math still in f32 inside the kernel).
    B3, C3 = 48, 128
    lg3 = jax.random.normal(k5, (B3, C3), dtype=jnp.float32).astype(jnp.bfloat16)
    lb3 = jax.nn.softmax(jax.random.normal(k6, (B3, C3), dtype=jnp.float32), axis=-1
                         ).astype(jnp.bfloat16)
    out3 = jax.block_until_ready(dense_cross_entropy(lg3, lb3))
    ref3 = ref_loss(lg3, lb3)
    assert jnp.allclose(out3, ref3, rtol=1e-4, atol=1e-4), (out3, ref3)

    print("KERNEL_OK")
</pallas_src>

<mosaic_0001>
module attributes {stable_mosaic.version = 11 : i64} {
  func.func @_dce_tile_kernel(%arg0: i32, %arg1: memref<16x128xf32, #tpu.memory_space<vmem>>, %arg2: memref<16x128xf32, #tpu.memory_space<vmem>>, %arg3: memref<1x1x1xf32, #tpu.memory_space<vmem>>) attributes {dimension_semantics = [#tpu.dimension_semantics<parallel>], iteration_bounds = array<i64: 1>, scalar_prefetch = 0 : i64, scratch_operands = 0 : i64, tpu.core_type = #tpu.core_type<tc>, window_params = [{transform_indices = @transform_0, window_bounds = array<i64: 16, 128>}, {transform_indices = @transform_1, window_bounds = array<i64: 16, 128>}, {transform_indices = @transform_2, window_bounds = array<i64: 1, 1, 1>}]} {
    %c0 = arith.constant 0 : index
    %c0_0 = arith.constant 0 : index
    %0 = vector.load %arg1[%c0, %c0_0] : memref<16x128xf32, #tpu.memory_space<vmem>>, vector<16x128xf32>
    %c0_1 = arith.constant 0 : index
    %c0_2 = arith.constant 0 : index
    %1 = vector.load %arg2[%c0_1, %c0_2] : memref<16x128xf32, #tpu.memory_space<vmem>>, vector<16x128xf32>
    %cst = arith.constant dense<0xFF800000> : vector<16xf32>
    %2 = vector.multi_reduction <maximumf>, %0, %cst [1] : vector<16x128xf32> to vector<16xf32>
    %3 = vector.shape_cast %2 : vector<16xf32> to vector<16x1xf32>
    %4 = vector.broadcast %3 : vector<16x1xf32> to vector<16x128xf32>
    %5 = arith.subf %0, %4 : vector<16x128xf32>
    %6 = math.exp %5 : vector<16x128xf32>
    %cst_3 = arith.constant dense<0.000000e+00> : vector<16xf32>
    %7 = vector.multi_reduction <add>, %6, %cst_3 [1] : vector<16x128xf32> to vector<16xf32>
    %8 = vector.shape_cast %7 : vector<16xf32> to vector<16x1xf32>
    %9 = math.log %8 : vector<16x1xf32>
    %cst_4 = arith.constant dense<0.000000e+00> : vector<16xf32>
    %10 = vector.multi_reduction <add>, %1, %cst_4 [1] : vector<16x128xf32> to vector<16xf32>
    %11 = vector.shape_cast %10 : vector<16xf32> to vector<16x1xf32>
    %12 = arith.mulf %1, %0 : vector<16x128xf32>
    %cst_5 = arith.constant dense<0.000000e+00> : vector<16xf32>
    %13 = vector.multi_reduction <add>, %12, %cst_5 [1] : vector<16x128xf32> to vector<16xf32>
    %14 = vector.shape_cast %13 : vector<16xf32> to vector<16x1xf32>
    %15 = arith.addf %3, %9 : vector<16x1xf32>
    %16 = arith.mulf %15, %11 : vector<16x1xf32>
    %17 = arith.subf %16, %14 : vector<16x1xf32>
    %18 = tpu.iota {dimensions = array<i32: 0>} : vector<16x1xi32>
    %c16_i32 = arith.constant 16 : i32
    %19 = arith.muli %arg0, %c16_i32 : i32
    %20 = vector.broadcast %19 : i32 to vector<16x1xi32>
    %21 = arith.addi %20, %18 : vector<16x1xi32>
    %c16_i32_6 = arith.constant 16 : i32
    %22 = vector.broadcast %c16_i32_6 : i32 to vector<16x1xi32>
    %23 = arith.cmpi slt, %21, %22 : vector<16x1xi32>
    %cst_7 = arith.constant 0.000000e+00 : f32
    %24 = vector.broadcast %cst_7 : f32 to vector<16x1xf32>
    %25 = arith.select %23, %17, %24 : vector<16x1xi1>, vector<16x1xf32>
    %26 = vector.shape_cast %25 : vector<16x1xf32> to vector<1x16x1xf32>
    %cst_8 = arith.constant dense<0.000000e+00> : vector<1xf32>
    %27 = vector.multi_reduction <add>, %26, %cst_8 [1, 2] : vector<1x16x1xf32> to vector<1xf32>
    %28 = vector.shape_cast %27 : vector<1xf32> to vector<1x1x1xf32>
    %29 = vector.extract %28[0, 0, 0] : f32 from vector<1x1x1xf32>
    %cst_9 = arith.constant 1.000000e+00 : f32
    %30 = vector.broadcast %cst_9 : f32 to vector<1x1x1xf32>
    %31 = vector.broadcast %29 : f32 to vector<1x1x1xf32>
    %32 = arith.mulf %31, %30 : vector<1x1x1xf32>
    %c0_10 = arith.constant 0 : index
    %c0_11 = arith.constant 0 : index
    %c0_12 = arith.constant 0 : index
    %33 = vector.load %arg3[%c0_10, %c0_11, %c0_12] : memref<1x1x1xf32, #tpu.memory_space<vmem>>, vector<1x1x1xf32>
    tpu.vector_store %arg3[%c0_10, %c0_11, %c0_12], %32 {strides = array<i32>} : memref<1x1x1xf32, #tpu.memory_space<vmem>>, vector<1x1x1xf32>,
    return
  }
  func.func @transform_0(%arg0: i32) -> (i32, i32) {
    %c0_i32 = arith.constant 0 : i32
    %c0_i32_0 = arith.constant 0 : i32
    return %arg0, %c0_i32 : i32, i32
  }
  func.func @transform_1(%arg0: i32) -> (i32, i32) {
    %c0_i32 = arith.constant 0 : i32
    %c0_i32_0 = arith.constant 0 : i32
    return %arg0, %c0_i32 : i32, i32
  }
  func.func @transform_2(%arg0: i32) -> (i32, i32, i32) {
    %c0_i32 = arith.constant 0 : i32
    %c0_i32_0 = arith.constant 0 : i32
    %c0_i32_1 = arith.constant 0 : i32
    return %arg0, %c0_i32, %c0_i32_0 : i32, i32, i32
  }
}

</mosaic_0001>

<bundles_post_ra>
// kernel: tpu_custom_call.1
= control target key start
LH: loop header
LB: loop body
LE: loop exit
PB: predicated region body
PF: predicated region fallthrough
CT: control target
= control target key end

     0   :  { %7 = vsyncpa [#allocation3], 0  ;;  %s231_s0 = inlined_call_operand.hbm [shape: f32[16,128], index: 0, kind: input, shape index: {}]   ;;  %s232_s1 = inlined_call_operand.hbm [shape: f32[16,128], index: 1, kind: input, shape index: {}]   ;;  %s233_s2 = inlined_call_operand.hbm [shape: f32[1,1,1], index: 2, kind: output, shape index: {}]  }
   0x1   :  { %8 = vsyncpa [#allocation6], 0 }
   0x2   :  { %9 = vsyncpa [#allocation4], 0  ;;  %s202_s9 = smov [#allocation2]  }
   0x3   :  { %s15_s10 = sshll.u32 %s202_s9, 4  ;;  %s16_s10 = int_to_ptr.vmem [resolvable:$true] %s15_s10 }
   0x4   :  { %s144_s11 = scalar_lea.vmem %s16_s10, 256  ;;  %p149_p1 = scmp.lt.s32.totalorder %s16_s10, %s16_s10 }
   0x5   :  { %p145_p0 = scmp.ne.s32.totalorder %s16_s10, %s144_s11  ;;  %p150_p2 = scmp.lt.s32.totalorder %s144_s11, %s144_s11 }
   0x7   :  { %p151_p3 = por %p150_p2, %p149_p1 }
   0x9   :  { %p152_p4 = pnand %p151_p3, %p145_p0 }
   0xb   :  { %155 = shalt.err (!%p152_p4)
}
   0xc   :  { %s203_s12 = smov 128   ;;  %s204_s13 = smov 8  }
   0xd   :  { %21 = dma.hbm_to_vmem [thread:$0]  %s231_s0, 256, %s16_s10, [#allocation3], %s203_s12, %s203_s12, %s204_s13  }
   0xe   :  { %s205_s16 = smov [#allocation5]  }
   0xf   :  { %s27_s17 = sshll.u32 %s205_s16, 4  ;;  %s28_s17 = int_to_ptr.vmem [resolvable:$true] %s27_s17 }
  0x10   :  { %s164_s18 = scalar_lea.vmem %s28_s17, 256  ;;  %p169_p6 = scmp.lt.s32.totalorder %s28_s17, %s28_s17 }
  0x11   :  { %p165_p5 = scmp.ne.s32.totalorder %s28_s17, %s164_s18  ;;  %p170_p7 = scmp.lt.s32.totalorder %s164_s18, %s164_s18 }
  0x13   :  { %p171_p8 = por %p170_p7, %p169_p6 }
  0x15   :  { %p172_p9 = pnand %p171_p8, %p165_p5 }
  0x17   :  { %175 = shalt.err (!%p172_p9)
}
  0x18   :  { %33 = dma.hbm_to_vmem [thread:$0]  %s232_s1, 256, %s28_s17, [#allocation6], %s203_s12, %s203_s12, %s204_s13  }
  0x19   :  { %196 = dma.done.wait [#allocation3], 256  }
  0x1a   :  { %197 = vsyncadd [#allocation3], 4294967040 }
  0x1b   :  { %198 = dma.done.wait [#allocation6], 256  }
  0x1c   :  { %199 = vsyncadd [#allocation6], 4294967040  ;;  %v40_v0 = vld [vmem:[#allocation2] sm:$0xff]  ;;  %v41_v1 = vld [vmem:[#allocation2 + $0x8] sm:$0xff]  ;;  %vm89_vm0 = vcmask 7168   ;;  %s206_s0 = smov [#allocation7]  }
  0x1d   :  { %44 = vmax.xlane.f32.xlu0 %v40_v0  ;;  %v42_v2 = vld [vmem:[#allocation5] sm:$0xff]  ;;  %v43_v12 = vld [vmem:[#allocation5 + $0x8] sm:$0xff]  ;;  %s111_s1 = sshll.u32 %s206_s0, 4  ;;  %vm103_vm1 = vcmask 0   ;;  %s112_s1 = int_to_ptr.vmem [resolvable:$true] %s111_s1 }
  0x1e   :  { %v66_v3 = vmul.f32 %v42_v2, %v40_v0  ;;  %v67_v13 = vmul.f32 %v43_v12, %v41_v1  ;;  %s176_s22 = scalar_lea.vmem %s112_s1, 16  ;;  %s180_s23 = scalar_lea.vmem %s112_s1, 32 }
  0x1f   :  { %p177_p10 = scmp.ne.s32.totalorder %s112_s1, %s176_s22  ;;  %p181_p11 = scmp.lt.s32.totalorder %s112_s1, %s112_s1 }
  0x20   :  { %p182_p12 = scmp.lt.s32.totalorder %s180_s23, %s176_s22 }
  0x21   :  { %46 = vmax.xlane.f32.xlu0 %v41_v1 }
  0x22   :  { %p183_p13 = por %p182_p12, %p181_p11 }
  0x24   :  { %p184_p0 = pnand %p183_p13, %p177_p10 }
  0x25   :  { %62 = vadd.xlane.f32.xlu0 %v42_v2 }
  0x29   :  { %68 = vadd.xlane.f32.xlu0 %v66_v3 }
  0xa6   :  { %v45_v4 = vpop.xlane.xlu0 %44 }
  0xa7   :  { %v48_v5 = vsub.f32 %v40_v0, %v45_v4 }
  0xa9   :  { %v50_v6 = vmul.f32 1.442695, %v48_v5 }
  0xaa   :  { %v47_v7 = vpop.xlane.xlu0 %46 }
  0xab   :  { %128 = vpow2.f32 %v50_v6  ;;  %v49_v8 = vsub.f32 %v41_v1, %v47_v7 }
  0xad   :  { %v52_v9 = vmul.f32 1.442695, %v49_v8 }
  0xae   :  { %v63_v17 = vpop.xlane.xlu0 %62 }
  0xaf   :  { %130 = vpow2.f32 %v52_v9 }
  0xb2   :  { %v69_v24 = vpop.xlane.xlu0 %68 }
  0xb8   :  { %v129_v10 = vpop.eup %128 }
  0xb9   :  { %54 = vadd.xlane.f32.xlu1 %v129_v10 }
  0xbc   :  { %v131_v11 = vpop.eup %130 }
  0xbd   :  { %56 = vadd.xlane.f32.xlu1 %v131_v11 }
  0xc1   :  { %64 = vadd.xlane.f32.xlu1 %v43_v12 }
  0xc5   :  { %70 = vadd.xlane.f32.xlu1 %v67_v13 }
 0x142   :  { %v55_v14 = vpop.xlane.xlu1 %54 }
 0x143   :  { %132 = vlog2.f32 %v55_v14 }
 0x146   :  { %v57_v15 = vpop.xlane.xlu1 %56 }
 0x147   :  { %134 = vlog2.f32 %v57_v15 }
 0x14a   :  { %v65_v19 = vpop.xlane.xlu1 %64 }
 0x14e   :  { %v71_v26 = vpop.xlane.xlu1 %70 }
 0x150   :  { %v133_v16 = vpop.eup %132 }
 0x151   :  { %v59_v18 = vmul.f32 0.6931472, %v133_v16 }
 0x153   :  { %v72_v20 = vadd.f32 %v59_v18, %v45_v4 }
 0x154   :  { %v135_v21 = vpop.eup %134 }
 0x155   :  { %v61_v22 = vmul.f32 0.6931472, %v135_v21  ;;  %v74_v23 = vmul.f32 %v72_v20, %v63_v17 }
 0x157   :  { %v73_v25 = vadd.f32 %v61_v22, %v47_v7  ;;  %v76_v28 = vsub.f32 %v74_v23, %v69_v24 }
 0x159   :  { %v75_v27 = vmul.f32 %v73_v25, %v65_v19  ;;  %v90_v30 = vsel %vm89_vm0, %v76_v28, 0.0 }
 0x15b   :  { %v77_v29 = vsub.f32 %v75_v27, %v71_v26 }
 0x15d   :  { %v91_v31 = vsel %vm89_vm0, %v77_v29, 0.0 }
 0x15e   :  { %v92_v32 = vadd.f32 %v91_v31, %v90_v30 }
 0x160   :  { %93 = vadd.xlane.f32.xlu0 %v92_v32 }
 0x1e9   :  { %v94_v33 = vpop.xlane.xlu0 %93 }
 0x1ea   :  { %v95_v34 = vrot.slane %v94_v33, 4 }
 0x1ec   :  { %v96_v35 = vadd.f32 %v95_v34, %v94_v33 }
 0x1ee   :  { %v97_v36 = vrot.slane %v96_v35, 2 }
 0x1f0   :  { %v98_v37 = vadd.f32 %v97_v36, %v96_v35 }
 0x1f2   :  { %v99_v38 = vrot.slane %v98_v37, 1 }
 0x1f4   :  { %v100_v39 = vadd.f32 %v99_v38, %v98_v37 }
 0x1f6   :  { %121 = vpush %v100_v39 }
 0x227   :  { %s122_s21 = spop %121 }
 0x228   :  { %v102_v40 = vstv %s122_s21 }
 0x229   :  { %104 = vst.msk [vmem:[#allocation7] sm:$0x1] %vm103_vm1, %v102_v40 }
 0x22a   :  { %187 = shalt.err (!%p184_p0)
}
 0x22b   :  { %114 = dma.vmem_to_hbm [thread:$0]  %s112_s1, 16, %s233_s2, [#allocation4]  }
 0x22c   :  { %200 = dma.done.wait [#allocation4], 16  }
 0x22d   :  { %201 = vsyncadd [#allocation4], 4294967280 }
 0x22e   :  { %118 = vsyncpa [#allocation3], 1 }
 0x22f   :  { %119 = vsyncpa [#allocation6], 1 }
 0x230   :  { %120 = vsyncpa [#allocation4], 1 }

</bundles_post_ra>
